<compile_context>
chip_gen: v5e
topology: v5e:2x2
jax: 0.10.0
libtpu: 0.0.40
codegen_flags: <defaults>
</compile_context>

<pallas_src>
import functools

import numpy as np
import jax
import jax.numpy as jnp
from jax import lax
from jax.experimental import pallas as pl
from jax.experimental.pallas import tpu as pltpu


def bottleneck_kernel(x_ref,            # (N, Cin, H*W)        f32
                      mask_ref,         # (9*Pp, N*H*W)        f32 edge masks
                      w1_ref, b1_ref,   # (Pp, Cin) bf16, (Pp, 1) f32   BN1 folded
                      w2_ref, b2_ref,   # (Pp, 9*Pp) bf16, (Pp, 1) f32  BN2 folded
                      w3_ref, b3_ref,   # (Cout, Pp) bf16, (Cout, 1) f32 BN3 folded
                      out_ref,          # (N, Cout, H*W)
                      *, H, W, N, compute_dtype):
    HW = H * W
    NHW = N * HW

    # Fold the batch into lanes: (Cin, N*HW).  Each image is a lane-aligned
    # 256-wide slab (multiple of 128), so this concat is pure VMEM placement.
    x = jnp.concatenate([x_ref[n] for n in range(N)], axis=-1)   # (Cin, NHW) f32

    # ---- conv1 (1x1) + bn1 + relu  (BN scale folded into w1) ----------------
    h1 = jnp.dot(w1_ref[...], x.astype(compute_dtype),
                 preferred_element_type=jnp.float32)             # (Pp, NHW)
    h1 = jnp.maximum(h1 + b1_ref[...], 0.0)                      # padded rows stay 0

    # ---- conv2 (3x3, pad=1, stride=1) + bn2 + relu --------------------------
    # Tap (dy, dx) of the zero-padded input is a lane-roll of the flattened
    # activation by dy*W + dx.  All 9 taps (each a full (8, NHW) sublane tile)
    # are concatenated into one (9*Pp, NHW) patch matrix; a single precomputed
    # mask multiply zeroes every position that would read across an image
    # boundary (including the cross-image / wraparound lanes), implementing
    # the zero padding.  One MXU matmul with K = 9*Pp does the whole conv.
    taps = []
    for dy in (-1, 0, 1):
        for dx in (-1, 0, 1):
            off = dy * W + dx
            taps.append(h1 if off == 0
                        else pltpu.roll(h1, shift=(-off) % NHW, axis=1))
    patches = jnp.concatenate(taps, axis=0)                      # (9*Pp, NHW)
    patches = patches * mask_ref[...]                            # one VPU multiply

    h2 = jnp.dot(w2_ref[...], patches.astype(compute_dtype),
                 preferred_element_type=jnp.float32)             # (Pp, NHW)
    h2 = jnp.maximum(h2 + b2_ref[...], 0.0)

    # ---- conv3 (1x1) + bn3 + residual + relu --------------------------------
    h3 = jnp.dot(w3_ref[...], h2.astype(compute_dtype),
                 preferred_element_type=jnp.float32)             # (Cout, NHW)
    out = jnp.maximum(h3 + b3_ref[...] + x, 0.0)                 # residual in f32

    for n in range(N):                                           # lane-aligned slices
        out_ref[n] = out[:, n * HW:(n + 1) * HW].astype(out_ref.dtype)


def _tap_masks(H, W):
    """Static (9, H*W) masks: 1 where tap (dy,dx) lands inside the image."""
    y = np.arange(H * W) // W
    x = np.arange(H * W) % W
    masks = []
    for dy in (-1, 0, 1):
        for dx in (-1, 0, 1):
            valid = ((y + dy >= 0) & (y + dy < H) &
                     (x + dx >= 0) & (x + dx < W))
            masks.append(valid.astype(np.float32))
    return np.stack(masks)


def fold_bottleneck_params(params, H, W, N, *, sublane=8,
                           compute_dtype=jnp.bfloat16):
    """One-time prep (outside the hot path): fold inference-mode BN into the
    conv weights, pad the bottleneck width P to a sublane multiple, reshape
    the 3x3 weights to the (Pp, 9*Pp) im2col layout, cast MXU weights to
    bf16, and build the row-expanded, batch-tiled edge mask."""
    (w1, s1, b1, w2, s2, b2, w3, s3, b3) = params
    Cin, P = w1.shape
    Cout = w3.shape[1]
    Pp = ((P + sublane - 1) // sublane) * sublane
    Pp = max(Pp, sublane)
    f32 = jnp.float32

    # conv1 + bn1 -> (Pp, Cin); padded output rows are zero.
    w1k = jnp.zeros((Pp, Cin), f32).at[:P].set(w1.T * s1[:, None])
    w1k = w1k.astype(compute_dtype)
    b1k = jnp.zeros((Pp, 1), f32).at[:P, 0].set(b1)

    # conv2 + bn2: HWIO -> (O, tap, I), pad both channel dims -> (Pp, 9*Pp).
    w2m = jnp.transpose(w2, (3, 0, 1, 2)).reshape(P, 9, P) * s2[:, None, None]
    w2k = (jnp.zeros((Pp, 9, Pp), f32).at[:P, :, :P].set(w2m)
           .reshape(Pp, 9 * Pp).astype(compute_dtype))
    b2k = jnp.zeros((Pp, 1), f32).at[:P, 0].set(b2)

    # conv3 + bn3 -> (Cout, Pp); padded input cols are zero.
    w3k = jnp.zeros((Cout, Pp), f32).at[:, :P].set(w3.T * s3[:, None])
    w3k = w3k.astype(compute_dtype)
    b3k = b3.reshape(Cout, 1).astype(f32)

    # Edge masks expanded to patch rows (tap t occupies rows [t*Pp, (t+1)*Pp))
    # and tiled across the batch-folded lane dimension.
    masks9 = _tap_masks(H, W)                       # (9, HW)
    mask72 = np.tile(np.repeat(masks9, Pp, axis=0), (1, N))   # (9*Pp, N*HW)
    mask72 = jnp.asarray(mask72, f32)

    return (mask72, w1k, b1k, w2k, b2k, w3k, b3k)


@jax.jit
def bottleneck_pallas(x_nchw, folded):
    mask72, w1k, b1k, w2k, b2k, w3k, b3k = folded
    N, Cin, H, W = x_nchw.shape
    HW = H * W
    Pp = w1k.shape[0]
    Cout = w3k.shape[0]
    assert Cout == Cin, "no-downsample Bottleneck requires inplanes == planes*4"
    compute_dtype = w1k.dtype

    x_flat = x_nchw.reshape(N, Cin, HW)            # free metadata reshape (NCHW)
    full2 = lambda a: pl.BlockSpec(a.shape, lambda i: (0, 0))

    # Single grid step: whole (tiny) problem fits comfortably in VMEM and
    # v5e/v6e are single-TC, so a batch grid would only add per-step overhead.
    # TODO(synk): on v7x, benchmark against a grid=(N,) "parallel" variant
    # that splits the two images across the two TensorCores.
    out_flat = pl.pallas_call(
        functools.partial(bottleneck_kernel, H=H, W=W, N=N,
                          compute_dtype=compute_dtype),
        out_shape=jax.ShapeDtypeStruct((N, Cout, HW), jnp.float32),
        grid=(1,),
        in_specs=[
            pl.BlockSpec((N, Cin, HW), lambda i: (0, 0, 0)),
            full2(mask72),
            full2(w1k), full2(b1k),
            full2(w2k), full2(b2k),
            full2(w3k), full2(b3k),
        ],
        out_specs=pl.BlockSpec((N, Cout, HW), lambda i: (0, 0, 0)),
        compiler_params=pltpu.CompilerParams(
            dimension_semantics=("arbitrary",)),
    )(x_flat, mask72, w1k, b1k, w2k, b2k, w3k, b3k)

    return out_flat.reshape(N, Cout, H, W)


def make_params(key, inplanes, planes, expansion=4, eps=1e-5):
    """Deterministic synthetic weights + inference-mode BN params."""
    ks = jax.random.split(key, 12)
    P, Cout = planes, planes * expansion

    w1 = jax.random.normal(ks[0], (inplanes, P), jnp.float32) * 0.1
    w2 = jax.random.normal(ks[1], (3, 3, P, P), jnp.float32) * 0.1   # HWIO
    w3 = jax.random.normal(ks[2], (P, Cout), jnp.float32) * 0.1

    def bn(kg, kb, km, kv, c):
        gamma = 1.0 + 0.1 * jax.random.normal(kg, (c,), jnp.float32)
        beta = 0.1 * jax.random.normal(kb, (c,), jnp.float32)
        mean = 0.1 * jax.random.normal(km, (c,), jnp.float32)
        var = jnp.abs(jax.random.normal(kv, (c,), jnp.float32)) + 0.5
        scale = gamma / jnp.sqrt(var + eps)
        shift = beta - mean * scale
        return scale, shift

    s1, b1 = bn(ks[3], ks[4], ks[5], ks[6], P)
    s2, b2 = bn(ks[7], ks[8], ks[9], ks[10], P)
    s3, b3 = bn(ks[11], ks[3], ks[5], ks[7], Cout)  # deterministic reuse is fine
    return (w1, s1, b1, w2, s2, b2, w3, s3, b3)


def bottleneck_ref(x_nchw, params):
    """Plain-JAX NCHW reference (matches the PyTorch module in eval mode)."""
    (w1, s1, b1, w2, s2, b2, w3, s3, b3) = params
    bc = lambda v: v[None, :, None, None]
    h = jnp.einsum('nchw,cp->nphw', x_nchw, w1)
    h = jax.nn.relu(h * bc(s1) + bc(b1))
    h = lax.conv_general_dilated(
        h, w2, window_strides=(1, 1), padding=((1, 1), (1, 1)),
        dimension_numbers=('NCHW', 'HWIO', 'NCHW'))
    h = jax.nn.relu(h * bc(s2) + bc(b2))
    h = jnp.einsum('nchw,cp->nphw', h, w3)
    h = h * bc(s3) + bc(b3)
    return jax.nn.relu(h + x_nchw)


if __name__ == "__main__":
    # PyTorch-side shapes: x is NCHW [2, 16, 16, 16], inplanes=16, planes=4.
    N, inplanes, H, W = 2, 16, 16, 16
    planes = 4

    key = jax.random.PRNGKey(0)
    kx, kp = jax.random.split(key)
    x_nchw = jax.random.normal(kx, (N, inplanes, H, W), jnp.float32)
    params = make_params(kp, inplanes, planes)

    # One-time param folding (hoisted out of the hot path).
    folded = fold_bottleneck_params(params, H, W, N)
    folded = jax.tree_util.tree_map(jax.block_until_ready, folded)

    out = bottleneck_pallas(x_nchw, folded)
    out = jax.block_until_ready(out)

    ref = bottleneck_ref(x_nchw, params)
    assert out.shape == (N, inplanes, H, W)
    # bf16 MXU operands with f32 accumulation/bias/residual -> widened tolerance
    # vs. the f32 reference.
    assert jnp.allclose(out, ref, rtol=2e-2, atol=2e-2), (
        float(jnp.max(jnp.abs(out - ref))))

    print("KERNEL_OK")
</pallas_src>

<mosaic_0001>
module attributes {stable_mosaic.version = 11 : i64} {
  func.func @bottleneck_kernel(%arg0: i32, %arg1: memref<2x16x256xf32, #tpu.memory_space<vmem>>, %arg2: memref<72x512xf32, #tpu.memory_space<vmem>>, %arg3: memref<8x16xbf16, #tpu.memory_space<vmem>>, %arg4: memref<8x1xf32, #tpu.memory_space<vmem>>, %arg5: memref<8x72xbf16, #tpu.memory_space<vmem>>, %arg6: memref<8x1xf32, #tpu.memory_space<vmem>>, %arg7: memref<16x8xbf16, #tpu.memory_space<vmem>>, %arg8: memref<16x1xf32, #tpu.memory_space<vmem>>, %arg9: memref<2x16x256xf32, #tpu.memory_space<vmem>>) attributes {dimension_semantics = [#tpu.dimension_semantics<arbitrary>], iteration_bounds = array<i64: 1>, scalar_prefetch = 0 : i64, scratch_operands = 0 : i64, tpu.core_type = #tpu.core_type<tc>, window_params = [{pipeline_mode = #tpu.pipeline_mode<synchronous>, transform_indices = @transform_0, window_bounds = array<i64: 2, 16, 256>}, {pipeline_mode = #tpu.pipeline_mode<synchronous>, transform_indices = @transform_1, window_bounds = array<i64: 72, 512>}, {pipeline_mode = #tpu.pipeline_mode<synchronous>, transform_indices = @transform_2, window_bounds = array<i64: 8, 16>}, {pipeline_mode = #tpu.pipeline_mode<synchronous>, transform_indices = @transform_3, window_bounds = array<i64: 8, 1>}, {pipeline_mode = #tpu.pipeline_mode<synchronous>, transform_indices = @transform_4, window_bounds = array<i64: 8, 72>}, {pipeline_mode = #tpu.pipeline_mode<synchronous>, transform_indices = @transform_5, window_bounds = array<i64: 8, 1>}, {pipeline_mode = #tpu.pipeline_mode<synchronous>, transform_indices = @transform_6, window_bounds = array<i64: 16, 8>}, {pipeline_mode = #tpu.pipeline_mode<synchronous>, transform_indices = @transform_7, window_bounds = array<i64: 16, 1>}, {pipeline_mode = #tpu.pipeline_mode<synchronous>, transform_indices = @transform_8, window_bounds = array<i64: 2, 16, 256>}]} {
    %c0 = arith.constant 0 : index
    %c0_0 = arith.constant 0 : index
    %c0_1 = arith.constant 0 : index
    %0 = vector.load %arg1[%c0, %c0_0, %c0_1] : memref<2x16x256xf32, #tpu.memory_space<vmem>>, vector<1x16x256xf32>
    %1 = vector.shape_cast %0 : vector<1x16x256xf32> to vector<16x256xf32>
    %c1 = arith.constant 1 : index
    %c0_2 = arith.constant 0 : index
    %c0_3 = arith.constant 0 : index
    %2 = vector.load %arg1[%c1, %c0_2, %c0_3] : memref<2x16x256xf32, #tpu.memory_space<vmem>>, vector<1x16x256xf32>
    %3 = vector.shape_cast %2 : vector<1x16x256xf32> to vector<16x256xf32>
    %4 = tpu.concatenate %1, %3 in 1 : vector<16x256xf32>, vector<16x256xf32> -> vector<16x512xf32>
    %c0_4 = arith.constant 0 : index
    %c0_5 = arith.constant 0 : index
    %5 = vector.load %arg3[%c0_4, %c0_5] : memref<8x16xbf16, #tpu.memory_space<vmem>>, vector<8x16xbf16>
    %6 = arith.truncf %4 : vector<16x512xf32> to vector<16x512xbf16>
    %cst = arith.constant dense<0.000000e+00> : vector<8x512xf32>
    %7 = tpu.matmul %5, %6, %cst {dimension_numbers = #tpu.dot_dimension_numbers<[1], [0], [0], [1], [0, 0, 1, 1], [], []>} : vector<8x16xbf16>, vector<16x512xbf16>, vector<8x512xf32> -> vector<8x512xf32>
    %c0_6 = arith.constant 0 : index
    %c0_7 = arith.constant 0 : index
    %8 = vector.load %arg4[%c0_6, %c0_7] : memref<8x1xf32, #tpu.memory_space<vmem>>, vector<8x1xf32>
    %9 = vector.broadcast %8 : vector<8x1xf32> to vector<8x512xf32>
    %10 = arith.addf %7, %9 : vector<8x512xf32>
    %cst_8 = arith.constant 0.000000e+00 : f32
    %11 = vector.broadcast %cst_8 : f32 to vector<8x512xf32>
    %12 = arith.maximumf %10, %11 : vector<8x512xf32>
    %c17_i32 = arith.constant 17 : i32
    %13 = tpu.dynamic_rotate %12 by %c17_i32 dim 1 : vector<8x512xf32>, i32 -> vector<8x512xf32>
    %c16_i32 = arith.constant 16 : i32
    %14 = tpu.dynamic_rotate %12 by %c16_i32 dim 1 : vector<8x512xf32>, i32 -> vector<8x512xf32>
    %c15_i32 = arith.constant 15 : i32
    %15 = tpu.dynamic_rotate %12 by %c15_i32 dim 1 : vector<8x512xf32>, i32 -> vector<8x512xf32>
    %c1_i32 = arith.constant 1 : i32
    %16 = tpu.dynamic_rotate %12 by %c1_i32 dim 1 : vector<8x512xf32>, i32 -> vector<8x512xf32>
    %c511_i32 = arith.constant 511 : i32
    %17 = tpu.dynamic_rotate %12 by %c511_i32 dim 1 : vector<8x512xf32>, i32 -> vector<8x512xf32>
    %c497_i32 = arith.constant 497 : i32
    %18 = tpu.dynamic_rotate %12 by %c497_i32 dim 1 : vector<8x512xf32>, i32 -> vector<8x512xf32>
    %c496_i32 = arith.constant 496 : i32
    %19 = tpu.dynamic_rotate %12 by %c496_i32 dim 1 : vector<8x512xf32>, i32 -> vector<8x512xf32>
    %c495_i32 = arith.constant 495 : i32
    %20 = tpu.dynamic_rotate %12 by %c495_i32 dim 1 : vector<8x512xf32>, i32 -> vector<8x512xf32>
    %21 = tpu.concatenate %13, %14, %15, %16, %12, %17, %18, %19, %20 in 0 : vector<8x512xf32>, vector<8x512xf32>, vector<8x512xf32>, vector<8x512xf32>, vector<8x512xf32>, vector<8x512xf32>, vector<8x512xf32>, vector<8x512xf32>, vector<8x512xf32> -> vector<72x512xf32>
    %c0_9 = arith.constant 0 : index
    %c0_10 = arith.constant 0 : index
    %22 = vector.load %arg2[%c0_9, %c0_10] : memref<72x512xf32, #tpu.memory_space<vmem>>, vector<72x512xf32>
    %23 = arith.mulf %21, %22 : vector<72x512xf32>
    %c0_11 = arith.constant 0 : index
    %c0_12 = arith.constant 0 : index
    %24 = vector.load %arg5[%c0_11, %c0_12] : memref<8x72xbf16, #tpu.memory_space<vmem>>, vector<8x72xbf16>
    %25 = arith.truncf %23 : vector<72x512xf32> to vector<72x512xbf16>
    %cst_13 = arith.constant dense<0.000000e+00> : vector<8x512xf32>
    %26 = tpu.matmul %24, %25, %cst_13 {dimension_numbers = #tpu.dot_dimension_numbers<[1], [0], [0], [1], [0, 0, 1, 1], [], []>} : vector<8x72xbf16>, vector<72x512xbf16>, vector<8x512xf32> -> vector<8x512xf32>
    %c0_14 = arith.constant 0 : index
    %c0_15 = arith.constant 0 : index
    %27 = vector.load %arg6[%c0_14, %c0_15] : memref<8x1xf32, #tpu.memory_space<vmem>>, vector<8x1xf32>
    %28 = vector.broadcast %27 : vector<8x1xf32> to vector<8x512xf32>
    %29 = arith.addf %26, %28 : vector<8x512xf32>
    %cst_16 = arith.constant 0.000000e+00 : f32
    %30 = vector.broadcast %cst_16 : f32 to vector<8x512xf32>
    %31 = arith.maximumf %29, %30 : vector<8x512xf32>
    %c0_17 = arith.constant 0 : index
    %c0_18 = arith.constant 0 : index
    %32 = vector.load %arg7[%c0_17, %c0_18] : memref<16x8xbf16, #tpu.memory_space<vmem>>, vector<16x8xbf16>
    %33 = arith.truncf %31 : vector<8x512xf32> to vector<8x512xbf16>
    %cst_19 = arith.constant dense<0.000000e+00> : vector<16x512xf32>
    %34 = tpu.matmul %32, %33, %cst_19 {dimension_numbers = #tpu.dot_dimension_numbers<[1], [0], [0], [1], [0, 0, 1, 1], [], []>} : vector<16x8xbf16>, vector<8x512xbf16>, vector<16x512xf32> -> vector<16x512xf32>
    %c0_20 = arith.constant 0 : index
    %c0_21 = arith.constant 0 : index
    %35 = vector.load %arg8[%c0_20, %c0_21] : memref<16x1xf32, #tpu.memory_space<vmem>>, vector<16x1xf32>
    %36 = vector.broadcast %35 : vector<16x1xf32> to vector<16x512xf32>
    %37 = arith.addf %34, %36 : vector<16x512xf32>
    %38 = arith.addf %37, %4 : vector<16x512xf32>
    %cst_22 = arith.constant 0.000000e+00 : f32
    %39 = vector.broadcast %cst_22 : f32 to vector<16x512xf32>
    %40 = arith.maximumf %38, %39 : vector<16x512xf32>
    %41 = vector.extract_strided_slice %40 {offsets = [0, 0], sizes = [16, 256], strides = [1, 1]} : vector<16x512xf32> to vector<16x256xf32>
    %c0_23 = arith.constant 0 : index
    %c0_24 = arith.constant 0 : index
    %c0_25 = arith.constant 0 : index
    %42 = vector.load %arg9[%c0_23, %c0_24, %c0_25] : memref<2x16x256xf32, #tpu.memory_space<vmem>>, vector<1x16x256xf32>
    %43 = vector.shape_cast %42 : vector<1x16x256xf32> to vector<16x256xf32>
    %44 = vector.shape_cast %41 : vector<16x256xf32> to vector<1x16x256xf32>
    tpu.vector_store %arg9[%c0_23, %c0_24, %c0_25], %44 {strides = array<i32>} : memref<2x16x256xf32, #tpu.memory_space<vmem>>, vector<1x16x256xf32>,
    %45 = vector.extract_strided_slice %40 {offsets = [0, 256], sizes = [16, 256], strides = [1, 1]} : vector<16x512xf32> to vector<16x256xf32>
    %c1_26 = arith.constant 1 : index
    %c0_27 = arith.constant 0 : index
    %c0_28 = arith.constant 0 : index
    %46 = vector.load %arg9[%c1_26, %c0_27, %c0_28] : memref<2x16x256xf32, #tpu.memory_space<vmem>>, vector<1x16x256xf32>
    %47 = vector.shape_cast %46 : vector<1x16x256xf32> to vector<16x256xf32>
    %48 = vector.shape_cast %45 : vector<16x256xf32> to vector<1x16x256xf32>
    tpu.vector_store %arg9[%c1_26, %c0_27, %c0_28], %48 {strides = array<i32>} : memref<2x16x256xf32, #tpu.memory_space<vmem>>, vector<1x16x256xf32>,
    return
  }
  func.func @transform_0(%arg0: i32) -> (i32, i32, i32) {
    %c0_i32 = arith.constant 0 : i32
    %c0_i32_0 = arith.constant 0 : i32
    %c0_i32_1 = arith.constant 0 : i32
    %c0_i32_2 = arith.constant 0 : i32
    return %c0_i32, %c0_i32_0, %c0_i32_1 : i32, i32, i32
  }
  func.func @transform_1(%arg0: i32) -> (i32, i32) {
    %c0_i32 = arith.constant 0 : i32
    %c0_i32_0 = arith.constant 0 : i32
    %c0_i32_1 = arith.constant 0 : i32
    return %c0_i32, %c0_i32_0 : i32, i32
  }
  func.func @transform_2(%arg0: i32) -> (i32, i32) {
    %c0_i32 = arith.constant 0 : i32
    %c0_i32_0 = arith.constant 0 : i32
    %c0_i32_1 = arith.constant 0 : i32
    return %c0_i32, %c0_i32_0 : i32, i32
  }
  func.func @transform_3(%arg0: i32) -> (i32, i32) {
    %c0_i32 = arith.constant 0 : i32
    %c0_i32_0 = arith.constant 0 : i32
    %c0_i32_1 = arith.constant 0 : i32
    return %c0_i32, %c0_i32_0 : i32, i32
  }
  func.func @transform_4(%arg0: i32) -> (i32, i32) {
    %c0_i32 = arith.constant 0 : i32
    %c0_i32_0 = arith.constant 0 : i32
    %c0_i32_1 = arith.constant 0 : i32
    return %c0_i32, %c0_i32_0 : i32, i32
  }
  func.func @transform_5(%arg0: i32) -> (i32, i32) {
    %c0_i32 = arith.constant 0 : i32
    %c0_i32_0 = arith.constant 0 : i32
    %c0_i32_1 = arith.constant 0 : i32
    return %c0_i32, %c0_i32_0 : i32, i32
  }
  func.func @transform_6(%arg0: i32) -> (i32, i32) {
    %c0_i32 = arith.constant 0 : i32
    %c0_i32_0 = arith.constant 0 : i32
    %c0_i32_1 = arith.constant 0 : i32
    return %c0_i32, %c0_i32_0 : i32, i32
  }
  func.func @transform_7(%arg0: i32) -> (i32, i32) {
    %c0_i32 = arith.constant 0 : i32
    %c0_i32_0 = arith.constant 0 : i32
    %c0_i32_1 = arith.constant 0 : i32
    return %c0_i32, %c0_i32_0 : i32, i32
  }
  func.func @transform_8(%arg0: i32) -> (i32, i32, i32) {
    %c0_i32 = arith.constant 0 : i32
    %c0_i32_0 = arith.constant 0 : i32
    %c0_i32_1 = arith.constant 0 : i32
    %c0_i32_2 = arith.constant 0 : i32
    return %c0_i32, %c0_i32_0, %c0_i32_1 : i32, i32, i32
  }
}

</mosaic_0001>

<bundles_post_ra>
// kernel: bottleneck_pallas.1
= control target key start
LH: loop header
LB: loop body
LE: loop exit
PB: predicated region body
PF: predicated region fallthrough
CT: control target
= control target key end

     0   :  { %v549_v3 = vmov 0   ;;  %vm50_vm0 = vcmask 130048   ;;  %s553_s25 = smov 127   ;;  %s554_s26 = smov 15   ;;  %v118_v41 = vlaneseq  ;;  %vm319_vm2 = vcmask 1043456   ;;  %s1013_s0 = inlined_call_operand.vmem [shape: f32[2,16,256], index: 0, kind: input, shape index: {}]   ;;  %s1014_s2 = inlined_call_operand.vmem [shape: bf16[8,16], index: 2, kind: input, shape index: {}]   ;;  %s1015_s3 = inlined_call_operand.vmem [shape: f32[8,1], index: 3, kind: input, shape index: {}]   ;;  %s1016_s5 = inlined_call_operand.vmem [shape: f32[8,1], index: 5, kind: input, shape index: {}]   ;;  %s1017_s1 = inlined_call_operand.vmem [shape: f32[72,512], index: 1, kind: input, shape index: {}]   ;;  %s1018_s4 = inlined_call_operand.vmem [shape: bf16[8,72], index: 4, kind: input, shape index: {}]   ;;  %s1019_s7 = inlined_call_operand.vmem [shape: f32[16,1], index: 7, kind: input, shape index: {}]   ;;  %s1020_s6 = inlined_call_operand.vmem [shape: bf16[16,8], index: 6, kind: input, shape index: {}]   ;;  %s1021_s8 = inlined_call_operand.vmem [shape: f32[2,16,256], index: 8, kind: output, shape index: {}]  }
   0x1   :  { %v606_v0 = vld [vmem:[%s1013_s0] sm:$0xff]  ;;  %v611_v1 = vld [vmem:[%s1013_s0 + $0x10] sm:$0xff]  ;;  %v616_v2 = vld [vmem:[%s1013_s0 + $0x8] sm:$0xff]  ;;  %546 = vset.pattern.permute.xlu0 %v549_v3  ;;  %547 = vset.pattern.permute.xlu1 %v549_v3  ;;  %s555_s27 = smov 1   ;;  %s556_s28 = smov 17   ;;  %vm315_vm10 = vcmask 588800  }
   0x2   :  { %v40_v4 = vpack.c.bf16 %v611_v1, %v606_v0  ;;  %v623_v5 = vld [vmem:[%s1013_s0 + $0x18] sm:$0xff]  ;;  %v628_v6 = vld [vmem:[%s1013_s0 + $0x20] sm:$0xff]  ;;  %v633_v7 = vld [vmem:[%s1013_s0 + $0x30] sm:$0xff]  ;;  %548 = vset.pattern.permute.xlu2 %v549_v3  ;;  %s557_s29 = smov 16   ;;  %v730_v43 = vand.u32 127, %v118_v41  ;;  %vm411_vm11 = vcmask 64512  }
   0x3   :  { %v41_v8 = vpack.c.bf16 %v623_v5, %v616_v2  ;;  %v42_v9 = vpack.c.bf16 %v633_v7, %v628_v6  ;;  %v642_v10 = vld [vmem:[%s1013_s0 + $0x28] sm:$0xff]  ;;  %v647_v11 = vld [vmem:[%s1013_s0 + $0x38] sm:$0xff]  ;;  %v39_v13 = vld [vmem:[%s1014_s2] sm:$0xf]  ;;  %s550_s0 = smov 112   ;;  %s551_s2 = smov 113  }
   0x4   :  { %61 = vmatpush.bf16.msra.mxu0 %v40_v4  ;;  %v43_v12 = vpack.c.bf16 %v647_v11, %v642_v10  ;;  %v44_v14 = vld [vmem:[%s1015_s3] sm:$0xff]  ;;  %s552_s3 = smov 111   ;;  %vm211_vm1 = vcmp.lt.s32.totalorder %v730_v43, 111  ;;  %v249_v52 = vld [vmem:[%s1017_s1 + $0x108] sm:$0xff]  ;;  %vm198_vm3 = vcmp.lt.s32.totalorder %v730_v43, 112  ;;  %vm185_vm4 = vcmp.lt.s32.totalorder %v730_v43, 113 }
   0x5   :  { %74 = vmatpush.bf16.msra.mxu1 %v41_v8  ;;  %87 = vmatpush.bf16.msra.mxu2 %v42_v9  ;;  %v309_v32 = vld [vmem:[%s1016_s5] sm:$0xff]  ;;  %v250_v60 = vld [vmem:[%s1017_s1 + $0x110] sm:$0xff]  ;;  %v251_v61 = vld [vmem:[%s1017_s1 + $0x118] sm:$0xff]  ;;  %vm172_vm5 = vcmp.lt.s32.totalorder %v730_v43, 127  ;;  %vm146_vm6 = vcmp.lt.s32.totalorder %v730_v43, 15  ;;  %vm159_vm7 = vcmp.lt.s32.totalorder %v730_v43, 1 }
   0x6   :  { %100 = vmatpush.bf16.msra.mxu3 %v43_v12  ;;  %47 = vperm.xlu0 %546, %v44_v14   ;;  %v248_v44 = vld [vmem:[%s1017_s1 + $0x100] sm:$0xff]  ;;  %v247_v3 = vld [vmem:[%s1017_s1 + $0xf8] sm:$0xff]  ;;  %v246_v8 = vld [vmem:[%s1017_s1 + $0xf0] sm:$0xff]  ;;  %vm133_vm8 = vcmp.lt.s32.totalorder %v730_v43, 16  ;;  %vm120_vm9 = vcmp.lt.s32.totalorder %v730_v43, 17 }
   0x7   :  { %516 = vmatmul.msk.bf16.vlgmr.msra.gmra.mxu0 %vm50_vm0, %v39_v13  ;;  %v395_v43 = vld [vmem:[%s1019_s7 + $0x8] sm:$0xff] }
   0x8   :  { %517 = vmatmul.msk.bf16.vlgmr.msra.gmra.mxu1 %vm50_vm0, %v39_v13  ;;  %518 = vmatmul.msk.bf16.vlgmr.msra.gmra.mxu2 %vm50_vm0, %v39_v13 }
   0x9   :  { %519 = vmatmul.msk.bf16.vlgmr.msra.gmra.mxu3 %vm50_vm0, %v39_v13 }
  0x78   :  { %v48_v15 = vpop.permute.xlu0 %47 }
  0x84   :  { %v63_v16 = vpop.f32.mrf.mxu0 }
  0x85   :  { %v64_v17 = vadd.f32 %v63_v16, %v48_v15  ;;  %v76_v18 = vpop.f32.mrf.mxu1 }
  0x86   :  { %v77_v20 = vadd.f32 %v76_v18, %v48_v15 }
  0x87   :  { %v657_v19 = vmax.f32 %v64_v17, 0.0  ;;  %v242_v17 = vld [vmem:[%s1017_s1 + $0xd0] sm:$0xff] }
  0x88   :  { %v664_v26 = vmax.f32 %v77_v20, 0.0 }
  0x89   :  { %190 = vrot.lane.b32.xlu1 %v657_v19, %s550_s0  ;;  %177 = vrot.lane.b32.xlu2 %v657_v19, %s551_s2 }
  0x8a   :  { %203 = vrot.lane.b32.xlu0 %v657_v19, %s552_s3 }
  0x8b   :  { %v89_v21 = vpop.f32.mrf.mxu2 }
  0x8c   :  { %v102_v22 = vpop.f32.mrf.mxu3  ;;  %v65_v23 = vpop.f32.mrf.mxu0  ;;  %v90_v30 = vadd.f32 %v89_v21, %v48_v15 }
  0x8d   :  { %v103_v24 = vadd.f32 %v102_v22, %v48_v15  ;;  %v78_v25 = vpop.f32.mrf.mxu1  ;;  %v243_v15 = vld [vmem:[%s1017_s1 + $0xd8] sm:$0xff] }
  0x8e   :  { %v678_v31 = vmax.f32 %v90_v30, 0.0  ;;  %v244_v30 = vld [vmem:[%s1017_s1 + $0xe0] sm:$0xff] }
  0x8f   :  { %v666_v27 = vmax.f32 %v103_v24, 0.0 }
  0x91   :  { %164 = vrot.lane.b32.xlu1 %v657_v19, %s553_s25  ;;  %140 = vrot.lane.b32.xlu2 %v664_v26, %s554_s26 }
  0x92   :  { %183 = vrot.lane.b32.xlu0 %v666_v27, %s551_s2 }
  0x93   :  { %v91_v28 = vpop.f32.mrf.mxu2 }
  0x94   :  { %v104_v29 = vpop.f32.mrf.mxu3 }
  0x99   :  { %205 = vrot.lane.b32.xlu1 %v664_v26, %s552_s3  ;;  %153 = vrot.lane.b32.xlu2 %v664_v26, %s555_s27 }
  0x9a   :  { %196 = vrot.lane.b32.xlu0 %v666_v27, %s550_s0 }
  0xa1   :  { %207 = vrot.lane.b32.xlu1 %v678_v31, %s552_s3  ;;  %112 = vrot.lane.b32.xlu2 %v664_v26, %s556_s28 }
  0xa2   :  { %192 = vrot.lane.b32.xlu0 %v664_v26, %s550_s0 }
  0xa9   :  { %209 = vrot.lane.b32.xlu1 %v666_v27, %s552_s3  ;;  %127 = vrot.lane.b32.xlu2 %v664_v26, %s557_s29 }
  0xaa   :  { %170 = vrot.lane.b32.xlu0 %v666_v27, %s553_s25 }
  0xb1   :  { %144 = vrot.lane.b32.xlu1 %v666_v27, %s554_s26  ;;  %181 = vrot.lane.b32.xlu2 %v678_v31, %s551_s2 }
  0xb2   :  { %142 = vrot.lane.b32.xlu0 %v678_v31, %s554_s26 }
  0xb9   :  { %157 = vrot.lane.b32.xlu1 %v666_v27, %s555_s27  ;;  %194 = vrot.lane.b32.xlu2 %v678_v31, %s550_s0 }
  0xba   :  { %155 = vrot.lane.b32.xlu0 %v678_v31, %s555_s27 }
  0xc1   :  { %116 = vrot.lane.b32.xlu1 %v666_v27, %s556_s28  ;;  %168 = vrot.lane.b32.xlu2 %v678_v31, %s553_s25 }
  0xc2   :  { %114 = vrot.lane.b32.xlu0 %v678_v31, %s556_s28 }
  0xc9   :  { %131 = vrot.lane.b32.xlu1 %v666_v27, %s557_s29  ;;  %179 = vrot.lane.b32.xlu2 %v664_v26, %s551_s2 }
  0xca   :  { %129 = vrot.lane.b32.xlu0 %v678_v31, %s557_s29 }
  0xd1   :  { %166 = vrot.lane.b32.xlu1 %v664_v26, %s553_s25  ;;  %138 = vrot.lane.b32.xlu2 %v657_v19, %s554_s26 }
  0xd2   :  { %151 = vrot.lane.b32.xlu0 %v657_v19, %s555_s27 }
  0xd9   :  { %110 = vrot.lane.b32.xlu1 %v657_v19, %s556_s28  ;;  %125 = vrot.lane.b32.xlu2 %v657_v19, %s557_s29 }
  0xda   :  { %312 = vperm.xlu0 %546, %v309_v32   ;;  %v238_v32 = vld [vmem:[%s1017_s1 + $0xb0] sm:$0xff] }
  0xe1   :  { %403 = vperm.xlu2 %548, %v395_v43  }
  0xe3   :  { %v716_v33 = vpop.permute.xlu2 %177 }
  0xeb   :  { %v718_v34 = vpop.permute.xlu2 %140 }
  0xf3   :  { %v720_v35 = vpop.permute.xlu2 %153 }
  0xfb   :  { %v722_v36 = vpop.permute.xlu1 %190  ;;  %v724_v37 = vpop.permute.xlu2 %112 }
  0xfc   :  { %v204_v38 = vpop.permute.xlu0 %203 }
 0x103   :  { %v726_v39 = vpop.permute.xlu1 %164  ;;  %v728_v40 = vpop.permute.xlu2 %127 }
 0x104   :  { %v184_v42 = vpop.permute.xlu0 %183 }
 0x105   :  { %v189_v16 = vsel %vm185_vm4, %v184_v42, %v716_v33 }
 0x106   :  { %v279_v28 = vmul.f32 %v243_v15, %v189_v16 }
 0x10b   :  { %v206_v45 = vpop.permute.xlu1 %205  ;;  %v736_v46 = vpop.permute.xlu2 %181 }
 0x10c   :  { %v214_v47 = vsel %vm211_vm1, %v204_v38, %v206_v45  ;;  %v197_v48 = vpop.permute.xlu0 %196  ;;  %v186_v18 = vsel %vm185_vm4, %v736_v46, %v184_v42 }
 0x10d   :  { %v284_v49 = vmul.f32 %v248_v44, %v214_v47  ;;  %v202_v4 = vsel %vm198_vm3, %v197_v48, %v722_v36  ;;  %v278_v29 = vmul.f32 %v242_v17, %v186_v18  ;;  %v245_v47 = vld [vmem:[%s1017_s1 + $0xe8] sm:$0xff] }
 0x10e   :  { %v283_v22 = vmul.f32 %v247_v3, %v202_v4 }
 0x10f   :  { %v305_v50 = vpack.c.bf16 %v284_v49, %v284_v49 }
 0x111   :  { %v321_v51 = vsel %vm319_vm2, %v305_v50, 0  ;;  %v240_v50 = vld [vmem:[%s1017_s1 + $0xc0] sm:$0xff] }
 0x112   :  { %335 = vmatpush.bf16.msrb.mxu0 %v321_v51  ;;  %v241_v51 = vld [vmem:[%s1017_s1 + $0xc8] sm:$0xff] }
 0x113   :  { %v208_v53 = vpop.permute.xlu1 %207  ;;  %v195_v54 = vpop.permute.xlu2 %194 }
 0x114   :  { %v213_v55 = vsel %vm211_vm1, %v206_v45, %v208_v53  ;;  %v193_v56 = vpop.permute.xlu0 %192  ;;  %v199_v9 = vsel %vm198_vm3, %v195_v54, %v197_v48 }
 0x115   :  { %v285_v57 = vmul.f32 %v249_v52, %v213_v55  ;;  %v282_v23 = vmul.f32 %v246_v8, %v199_v9  ;;  %v200_v48 = vsel %vm198_vm3, %v193_v56, %v195_v54  ;;  %v201_v49 = vsel %vm198_vm3, %v722_v36, %v193_v56  ;;  %v234_v54 = vld [vmem:[%s1017_s1 + $0x90] sm:$0xff]  ;;  %v235_v36 = vld [vmem:[%s1017_s1 + $0x98] sm:$0xff] }
 0x116   :  { %v281_v3 = vmul.f32 %v245_v47, %v200_v48  ;;  %v270_v9 = vmul.f32 %v234_v54, %v678_v31  ;;  %v223_v54 = vld [vmem:[%s1017_s1 + $0x38] sm:$0xff] }
 0x117   :  { %v306_v58 = vpack.c.bf16 %v285_v57, %v285_v57  ;;  %v303_v55 = vpack.c.bf16 %v282_v23, %v278_v29  ;;  %v304_v57 = vpack.c.bf16 %v283_v22, %v279_v28 }
 0x119   :  { %v324_v59 = vsel %vm319_vm2, %v306_v58, 0 }
 0x11a   :  { %348 = vmatpush.bf16.msrb.mxu1 %v324_v59 }
 0x11b   :  { %v210_v62 = vpop.permute.xlu1 %209  ;;  %v755_v63 = vpop.permute.xlu2 %168 }
 0x11c   :  { %v212_v12 = vsel %vm211_vm1, %v208_v53, %v210_v62  ;;  %v215_v13 = vsel %vm211_vm1, %v210_v62, %v204_v38  ;;  %v171_v14 = vpop.permute.xlu0 %170  ;;  %v239_v38 = vld [vmem:[%s1017_s1 + $0xb8] sm:$0xff]  ;;  %v280_v62 = vmul.f32 %v244_v30, %v201_v49  ;;  %v218_v49 = vld [vmem:[%s1017_s1 + $0x10] sm:$0xff] }
 0x11d   :  { %v286_v20 = vmul.f32 %v250_v60, %v212_v12  ;;  %v287_v21 = vmul.f32 %v251_v61, %v215_v13  ;;  %v173_v41 = vsel %vm172_vm5, %v755_v63, %v171_v14  ;;  %v176_v42 = vsel %vm172_vm5, %v171_v14, %v726_v39 }
 0x11e   :  { %v274_v56 = vmul.f32 %v238_v32, %v173_v41  ;;  %v275_v58 = vmul.f32 %v239_v38, %v176_v42  ;;  %v271_v12 = vmul.f32 %v235_v36, %v666_v27  ;;  %v227_v27 = vld [vmem:[%s1017_s1 + $0x58] sm:$0xff]  ;;  %v221_v41 = vld [vmem:[%s1017_s1 + $0x28] sm:$0xff] }
 0x11f   :  { %v307_v24 = vpack.c.bf16 %v286_v20, %v286_v20  ;;  %v308_v25 = vpack.c.bf16 %v287_v21, %v287_v21  ;;  %v230_v20 = vld [vmem:[%s1017_s1 + $0x70] sm:$0xff]  ;;  %v231_v21 = vld [vmem:[%s1017_s1 + $0x78] sm:$0xff] }
 0x120   :  { %v300_v15 = vpack.c.bf16 %v275_v58, %v271_v12  ;;  %v237_v12 = vld [vmem:[%s1017_s1 + $0xa8] sm:$0xff] }
 0x121   :  { %v327_v44 = vsel %vm319_vm2, %v307_v24, 0  ;;  %v330_v45 = vsel %vm319_vm2, %v308_v25, 0 }
 0x122   :  { %361 = vmatpush.bf16.msrb.mxu2 %v327_v44  ;;  %374 = vmatpush.bf16.msrb.mxu3 %v330_v45 }
 0x123   :  { %v816_v52 = vpop.permute.xlu1 %144  ;;  %v180_v53 = vpop.permute.xlu2 %179 }
 0x124   :  { %v187_v59 = vsel %vm185_vm4, %v180_v53, %v736_v46  ;;  %v188_v60 = vsel %vm185_vm4, %v716_v33, %v180_v53  ;;  %v143_v61 = vpop.permute.xlu0 %142  ;;  %v299_v46 = vpack.c.bf16 %v274_v56, %v270_v9  ;;  %v226_v33 = vld [vmem:[%s1017_s1 + $0x50] sm:$0xff]  ;;  %v233_v9 = vld [vmem:[%s1017_s1 + $0x88] sm:$0xff] }
 0x125   :  { %v276_v4 = vmul.f32 %v240_v50, %v188_v60  ;;  %v277_v8 = vmul.f32 %v241_v51, %v187_v59  ;;  %v147_v31 = vsel %vm146_vm6, %v143_v61, %v816_v52  ;;  %v148_v16 = vsel %vm146_vm6, %v718_v34, %v143_v61  ;;  %v219_v50 = vld [vmem:[%s1017_s1 + $0x18] sm:$0xff] }
 0x126   :  { %362 = vmatpush.bf16.msrb.mxu2 %v303_v55  ;;  %375 = vmatpush.bf16.msrb.mxu3 %v304_v57  ;;  %v262_v25 = vmul.f32 %v226_v33, %v148_v16  ;;  %v263_v28 = vmul.f32 %v227_v27, %v147_v31  ;;  %v222_v57 = vld [vmem:[%s1017_s1 + $0x30] sm:$0xff]  ;;  %v228_v33 = vld [vmem:[%s1017_s1 + $0x60] sm:$0xff]  ;;  %v229_v27 = vld [vmem:[%s1017_s1 + $0x68] sm:$0xff] }
 0x127   :  { %v301_v13 = vpack.c.bf16 %v280_v62, %v276_v4  ;;  %v302_v14 = vpack.c.bf16 %v281_v3, %v277_v8  ;;  %v232_v8 = vld [vmem:[%s1017_s1 + $0x80] sm:$0xff] }
 0x128   :  { %v268_v16 = vmul.f32 %v232_v8, %v657_v19  ;;  %v225_v19 = vld [vmem:[%s1017_s1 + $0x48] sm:$0xff] }
 0x129   :  { %336 = vmatpush.bf16.msrb.mxu0 %v301_v13  ;;  %349 = vmatpush.bf16.msrb.mxu1 %v302_v14  ;;  %v288_v13 = vld [vmem:[%s1018_s4] sm:$0xf] }
 0x12a   :  { %363 = vmatpush.bf16.msrb.mxu2 %v299_v46  ;;  %376 = vmatpush.bf16.msrb.mxu3 %v300_v15 }
 0x12b   :  { %v158_v17 = vpop.permute.xlu1 %157  ;;  %v846_v18 = vpop.permute.xlu2 %138 }
 0x12c   :  { %v156_v22 = vpop.permute.xlu0 %155 }
 0x12d   :  { %v160_v23 = vsel %vm159_vm7, %v156_v22, %v158_v17  ;;  %v161_v24 = vsel %vm159_vm7, %v720_v35, %v156_v22 }
 0x12e   :  { %v266_v29 = vmul.f32 %v230_v20, %v161_v24  ;;  %v267_v30 = vmul.f32 %v231_v21, %v160_v23  ;;  %v269_v20 = vmul.f32 %v233_v9, %v664_v26  ;;  %v224_v23 = vld [vmem:[%s1017_s1 + $0x40] sm:$0xff]  ;;  %v149_v26 = vsel %vm146_vm6, %v846_v18, %v718_v34 }
 0x130   :  { %v295_v32 = vpack.c.bf16 %v266_v29, %v262_v25  ;;  %v296_v38 = vpack.c.bf16 %v267_v30, %v263_v28  ;;  %v261_v30 = vmul.f32 %v225_v19, %v149_v26 }
 0x132   :  { %364 = vmatpush.bf16.msrb.mxu2 %v295_v32  ;;  %377 = vmatpush.bf16.msrb.mxu3 %v296_v38  ;;  %v220_v32 = vld [vmem:[%s1017_s1 + $0x20] sm:$0xff] }
 0x133   :  { %v863_v42 = vpop.permute.xlu1 %116  ;;  %v126_v44 = vpop.permute.xlu2 %125 }
 0x134   :  { %v136_v45 = vsel %vm133_vm8, %v126_v44, %v728_v40  ;;  %v115_v47 = vpop.permute.xlu0 %114 }
 0x135   :  { %v868_v48 = vmul.f32 %v221_v41, %v136_v45  ;;  %v121_v51 = vsel %vm120_vm9, %v115_v47, %v863_v42  ;;  %v122_v53 = vsel %vm120_vm9, %v724_v37, %v115_v47 }
 0x136   :  { %v254_v59 = vmul.f32 %v218_v49, %v122_v53  ;;  %v255_v60 = vmul.f32 %v219_v50, %v121_v51 }
 0x13b   :  { %v132_v55 = vpop.permute.xlu1 %131 }
 0x13c   :  { %v130_v36 = vpop.permute.xlu0 %129  ;;  %v137_v34 = vsel %vm133_vm8, %v132_v55, %v126_v44 }
 0x13d   :  { %v134_v56 = vsel %vm133_vm8, %v130_v36, %v132_v55  ;;  %v135_v58 = vsel %vm133_vm8, %v728_v40, %v130_v36  ;;  %v236_v40 = vld [vmem:[%s1017_s1 + $0xa0] sm:$0xff]  ;;  %v256_v44 = vmul.f32 %v220_v32, %v137_v34  ;;  %v404_v32 = vpop.permute.xlu2 %403 }
 0x13e   :  { %v258_v61 = vmul.f32 %v222_v57, %v135_v58  ;;  %v259_v62 = vmul.f32 %v223_v54, %v134_v56 }
 0x140   :  { %v291_v3 = vpack.c.bf16 %v258_v61, %v254_v59  ;;  %v292_v4 = vpack.c.bf16 %v259_v62, %v255_v60  ;;  %v536_v62 = vld [vmem:[%s1020_s6] sm:$0xff] }
 0x142   :  { %365 = vmatpush.bf16.msrb.mxu2 %v291_v3  ;;  %378 = vmatpush.bf16.msrb.mxu3 %v292_v4 }
 0x143   :  { %v167_v14 = vpop.permute.xlu1 %166 }
 0x144   :  { %v174_v46 = vsel %vm172_vm5, %v167_v14, %v755_v63  ;;  %v175_v15 = vsel %vm172_vm5, %v726_v39, %v167_v14  ;;  %v152_v31 = vpop.permute.xlu0 %151 }
 0x145   :  { %v272_v21 = vmul.f32 %v236_v40, %v175_v15  ;;  %v273_v22 = vmul.f32 %v237_v12, %v174_v46  ;;  %v162_v63 = vsel %vm159_vm7, %v152_v31, %v720_v35  ;;  %v163_v39 = vsel %vm159_vm7, %v158_v17, %v152_v31  ;;  %522 = vmatmul.msk.bf16.vlgmr.msrb.gmra.mxu2 %vm315_vm10, %v288_v13 }
 0x146   :  { %v150_v35 = vsel %vm146_vm6, %v816_v52, %v846_v18  ;;  %523 = vmatmul.msk.bf16.vlgmr.msrb.gmra.mxu3 %vm315_vm10, %v288_v13  ;;  %v264_v17 = vmul.f32 %v228_v33, %v163_v39  ;;  %v265_v24 = vmul.f32 %v229_v27, %v162_v63  ;;  %v216_v52 = vld [vmem:[%s1017_s1] sm:$0xff]  ;;  %v217_v18 = vld [vmem:[%s1017_s1 + $0x8] sm:$0xff] }
 0x147   :  { %v297_v25 = vpack.c.bf16 %v272_v21, %v268_v16  ;;  %v298_v28 = vpack.c.bf16 %v273_v22, %v269_v20  ;;  %v260_v29 = vmul.f32 %v224_v23, %v150_v35 }
 0x148   :  { %v294_v45 = vpack.c.bf16 %v265_v24, %v261_v30 }
 0x149   :  { %337 = vmatpush.bf16.msrb.mxu0 %v297_v25  ;;  %350 = vmatpush.bf16.msrb.mxu1 %v298_v28  ;;  %v293_v41 = vpack.c.bf16 %v264_v17, %v260_v29 }
 0x14b   :  { %v111_v38 = vpop.permute.xlu1 %110 }
 0x14c   :  { %v123_v47 = vsel %vm120_vm9, %v111_v38, %v724_v37  ;;  %v124_v49 = vsel %vm120_vm9, %v863_v42, %v111_v38  ;;  %v394_v37 = vld [vmem:[%s1019_s7] sm:$0xff]  ;;  %v313_v42 = vpop.permute.xlu0 %312 }
 0x14d   :  { %v252_v50 = vmul.f32 %v216_v52, %v124_v49  ;;  %v253_v51 = vmul.f32 %v217_v18, %v123_v47  ;;  %338 = vmatpush.bf16.msrb.mxu0 %v293_v41  ;;  %351 = vmatpush.bf16.msrb.mxu1 %v294_v45 }
 0x14e   :  { %398 = vperm.xlu1 %547, %v394_v37  }
 0x14f   :  { %v289_v53 = vpack.c.bf16 %v256_v44, %v252_v50  ;;  %v290_v55 = vpack.c.bf16 %v868_v48, %v253_v51 }
 0x151   :  { %339 = vmatpush.bf16.msrb.mxu0 %v289_v53  ;;  %352 = vmatpush.bf16.msrb.mxu1 %v290_v55 }
 0x154   :  { %520 = vmatmul.msk.bf16.vlgmr.msrb.gmra.mxu0 %vm315_vm10, %v288_v13  ;;  %521 = vmatmul.msk.bf16.vlgmr.msrb.gmra.mxu1 %vm315_vm10, %v288_v13 }
 0x1c0   :  { %v399_v21 = vpop.permute.xlu1 %398 }
 0x1c8   :  { %v367_v57 = vpop.f32.mrf.mxu2 }
 0x1c9   :  { %v368_v54 = vadd.f32 %v367_v57, %v313_v42  ;;  %v380_v48 = vpop.f32.mrf.mxu3 }
 0x1ca   :  { %v381_v36 = vadd.f32 %v380_v48, %v313_v42 }
 0x1cb   :  { %v386_v56 = vmax.f32 %v368_v54, 0.0 }
 0x1cc   :  { %v387_v58 = vmax.f32 %v381_v36, 0.0 }
 0x1cd   :  { %v392_v59 = vpack.c.bf16 %v386_v56, %v386_v56 }
 0x1ce   :  { %v393_v60 = vpack.c.bf16 %v387_v58, %v387_v58 }
 0x1cf   :  { %v422_v61 = vsel %vm319_vm2, %v392_v59, 0 }
 0x1d0   :  { %v369_v3 = vpop.f32.mrf.mxu2  ;;  %462 = vmatpush.bf16.msra.mxu2 %v422_v61  ;;  %v425_v4 = vsel %vm319_vm2, %v393_v60, 0 }
 0x1d1   :  { %v382_v8 = vpop.f32.mrf.mxu3  ;;  %476 = vmatpush.bf16.msra.mxu3 %v425_v4  ;;  %v341_v9 = vpop.f32.mrf.mxu0 }
 0x1d2   :  { %v342_v40 = vadd.f32 %v341_v9, %v313_v42  ;;  %v354_v12 = vpop.f32.mrf.mxu1 }
 0x1d3   :  { %v355_v13 = vadd.f32 %v354_v12, %v313_v42  ;;  %530 = vmatmul.msk.bf16.vlgmr.msra.gmra.mxu2 %vm411_vm11, %v536_v62 }
 0x1d4   :  { %v384_v14 = vmax.f32 %v342_v40, 0.0  ;;  %531 = vmatmul.msk.bf16.vlgmr.msra.gmra.mxu3 %vm411_vm11, %v536_v62 }
 0x1d5   :  { %v385_v46 = vmax.f32 %v355_v13, 0.0 }
 0x1d6   :  { %v390_v15 = vpack.c.bf16 %v384_v14, %v384_v14 }
 0x1d7   :  { %v391_v33 = vpack.c.bf16 %v385_v46, %v385_v46 }
 0x1d8   :  { %v416_v27 = vsel %vm319_vm2, %v390_v15, 0 }
 0x1d9   :  { %v343_v31 = vpop.f32.mrf.mxu0  ;;  %434 = vmatpush.bf16.msra.mxu0 %v416_v27  ;;  %v419_v16 = vsel %vm319_vm2, %v391_v33, 0 }
 0x1da   :  { %v356_v20 = vpop.f32.mrf.mxu1  ;;  %448 = vmatpush.bf16.msra.mxu1 %v419_v16 }
 0x1dc   :  { %528 = vmatmul.msk.bf16.vlgmr.msra.gmra.mxu0 %vm411_vm11, %v536_v62 }
 0x1dd   :  { %529 = vmatmul.msk.bf16.vlgmr.msra.gmra.mxu1 %vm411_vm11, %v536_v62 }
 0x256   :  { %v464_v22 = vpop.f32.mrf.mxu2 }
 0x257   :  { %v478_v63 = vpop.f32.mrf.mxu3  ;;  %v465_v39 = vadd.f32 %v464_v22, %v399_v21 }
 0x258   :  { %v479_v23 = vadd.f32 %v478_v63, %v399_v21 }
 0x259   :  { %v436_v19 = vpop.f32.mrf.mxu0  ;;  %v485_v26 = vadd.f32 %v628_v6, %v465_v39 }
 0x25a   :  { %v450_v35 = vpop.f32.mrf.mxu1  ;;  %v437_v17 = vadd.f32 %v436_v19, %v399_v21  ;;  %v486_v24 = vadd.f32 %v642_v10, %v479_v23 }
 0x25b   :  { %v451_v25 = vadd.f32 %v450_v35, %v399_v21  ;;  %v493_v28 = vmax.f32 %v485_v26, 0.0 }
 0x25c   :  { %v483_v29 = vadd.f32 %v437_v17, %v606_v0  ;;  %v494_v30 = vmax.f32 %v486_v24, 0.0 }
 0x25d   :  { %v484_v34 = vadd.f32 %v451_v25, %v616_v2  ;;  %532 = vst [vmem:[%s1021_s8 + $0x20] sm:$0xff] %v493_v28 }
 0x25e   :  { %v491_v52 = vmax.f32 %v483_v29, 0.0  ;;  %533 = vst [vmem:[%s1021_s8 + $0x28] sm:$0xff] %v494_v30  ;;  %v466_v6 = vpop.f32.mrf.mxu2 }
 0x25f   :  { %v492_v18 = vmax.f32 %v484_v34, 0.0  ;;  %v467_v10 = vadd.f32 %v466_v6, %v404_v32  ;;  %v480_v38 = vpop.f32.mrf.mxu3 }
 0x260   :  { %499 = vst [vmem:[%s1021_s8] sm:$0xff] %v491_v52  ;;  %v481_v0 = vadd.f32 %v480_v38, %v404_v32 }
 0x261   :  { %500 = vst [vmem:[%s1021_s8 + $0x8] sm:$0xff] %v492_v18  ;;  %v438_v2 = vpop.f32.mrf.mxu0  ;;  %v489_v41 = vadd.f32 %v633_v7, %v467_v10 }
 0x262   :  { %v439_v45 = vadd.f32 %v438_v2, %v404_v32  ;;  %v452_v47 = vpop.f32.mrf.mxu1  ;;  %v490_v49 = vadd.f32 %v647_v11, %v481_v0 }
 0x263   :  { %v453_v44 = vadd.f32 %v452_v47, %v404_v32  ;;  %v497_v50 = vmax.f32 %v489_v41, 0.0 }
 0x264   :  { %v487_v51 = vadd.f32 %v439_v45, %v611_v1  ;;  %v498_v53 = vmax.f32 %v490_v49, 0.0 }
 0x265   :  { %v488_v55 = vadd.f32 %v453_v44, %v623_v5  ;;  %534 = vst [vmem:[%s1021_s8 + $0x30] sm:$0xff] %v497_v50 }
 0x266   :  { %v495_v37 = vmax.f32 %v487_v51, 0.0  ;;  %535 = vst [vmem:[%s1021_s8 + $0x38] sm:$0xff] %v498_v53 }
 0x267   :  { %v496_v7 = vmax.f32 %v488_v55, 0.0 }
 0x268   :  { %501 = vst [vmem:[%s1021_s8 + $0x10] sm:$0xff] %v495_v37 }
 0x269   :  { %502 = vst [vmem:[%s1021_s8 + $0x18] sm:$0xff] %v496_v7 }

</bundles_post_ra>
